<compile_context>
chip_gen: v6e
topology: v6e:2x2x1
jax: 0.10.0
libtpu: 0.0.40
codegen_flags: <defaults>
</compile_context>

<pallas_src>
import functools

import jax
import jax.numpy as jnp
from jax.experimental import pallas as pl
from jax.experimental.pallas import tpu as pltpu

HIDDEN = 256
_MXU = 256                             # MXU width on v6e/v7x; harmless on v5e
_VMEM_LIMIT = 48 * 1024 * 1024         # explicit scoped-VMEM limit (v7x-safe)
_VMEM_TILE_BUDGET = 36 * 1024 * 1024   # what the tile chooser may spend


def _round_up(x, m):
    return ((x + m - 1) // m) * m


def _leaky_relu(x, slope=0.2):
    # slope in (0, 1) => max(x, slope*x) == LeakyReLU(slope)(x); saves a VPU op.
    return jnp.maximum(x, slope * x)


def discriminator_kernel(x_ref, w1_ref, b1_ref, w2_ref, b2_ref, w3t_ref, b3_ref,
                         o_ref):
    cdt = w1_ref.dtype                                          # compute dtype
    x = x_ref[...].astype(cdt)                                  # [bb, D]
    h1 = jnp.dot(x, w1_ref[...],
                 preferred_element_type=jnp.float32) + b1_ref[...]
    h1 = _leaky_relu(h1).astype(cdt)                            # [bb, 256]
    h2 = jnp.dot(h1, w2_ref[...],
                 preferred_element_type=jnp.float32) + b2_ref[...]
    h2 = _leaky_relu(h2).astype(cdt)                            # [bb, 256]
    # Last layer directly in transposed orientation: W3^T [1,256] x h2 [bb,256]
    # contracted on the 256 axis -> [1, bb].  The store is a lane-dense (1, bb)
    # tile: no 128-wide padding, no masked vst.msk single-lane stores.
    h3t = jax.lax.dot_general(w3t_ref[...], h2,
                              (((1,), (1,)), ((), ())),
                              preferred_element_type=jnp.float32)  # [1, bb]
    o_ref[...] = jax.nn.sigmoid(h3t + b3_ref[...]).astype(o_ref.dtype)


def _choose_block_b(block_b, B, D, x_itemsize, w_itemsize):
    """Batch tile: fill the MXU, respect VMEM (weights included), keep a few steps."""
    B_pad = _round_up(B, 8)
    # Requested tile, as a multiple of the MXU width, at least 256.
    bb = max(_MXU, _round_up(block_b, _MXU))
    bb = min(bb, _round_up(B_pad, _MXU))

    # VMEM accounting (constant-index-map weights are still double-buffered).
    weight_bytes = 2 * ((D * HIDDEN + HIDDEN * HIDDEN + HIDDEN) * w_itemsize
                        + (2 * HIDDEN + 1) * 4)
    per_row = (2 * D * x_itemsize      # double-buffered x tile
               + 2 * 4                 # double-buffered (1, bb) f32 out tile
               + 4 * HIDDEN * 4)       # in-kernel f32 h1/h2 (+ cast) temporaries
    max_bb = max(0, _VMEM_TILE_BUDGET - weight_bytes) // per_row
    bb = max(8, min(bb, (max_bb // 8) * 8))
    # TODO(synk): for very large D (when per_row forces bb below ~256), add a
    # second "arbitrary" grid axis over D with a (bb, 256) f32 VMEM accumulator
    # for the first matmul instead of shrinking the batch tile.

    # Keep several grid steps on large batches so v7x's two TensorCores both
    # get work and the DMA pipeline can overlap (v6e/v5e: fewer, bigger steps).
    if B_pad >= 16 * _MXU:                                   # B >= 4096
        bb = min(bb, max(_MXU, _round_up(pl.cdiv(B_pad, 4), _MXU)))
    elif B_pad >= 2 * _MXU:                                  # B >= 512
        bb = min(bb, max(_MXU, _round_up(pl.cdiv(B_pad, 2), _MXU)))

    return min(bb, B_pad)


def prepare_params(params, compute_dtype=jnp.float32):
    """One-time param prep: weight casts + W3 transpose, hoisted out of forward."""
    w1, b1, w2, b2, w3, b3 = params
    cdt = jnp.dtype(compute_dtype)
    return (w1.astype(cdt),                       # [D, 256]
            b1.astype(jnp.float32),               # [1, 256]
            w2.astype(cdt),                       # [256, 256]
            b2.astype(jnp.float32),               # [1, 256]
            jnp.transpose(w3).astype(cdt),        # [1, 256]  (W3^T)
            b3.reshape(1, 1).astype(jnp.float32)) # [1, 1]


@functools.partial(jax.jit, static_argnames=("block_b",))
def discriminator_forward(x, prepared_params, block_b=1024):
    """Fused Discriminator forward. Returns [B, 1] float32 probabilities."""
    B, D = x.shape
    w1, b1, w2, b2, w3t, b3 = prepared_params

    bb = _choose_block_b(block_b, B, D,
                         jnp.dtype(x.dtype).itemsize,
                         jnp.dtype(w1.dtype).itemsize)
    n_tiles = pl.cdiv(B, bb)

    out = pl.pallas_call(
        discriminator_kernel,
        out_shape=jax.ShapeDtypeStruct((n_tiles, bb), jnp.float32),
        grid_spec=pltpu.PrefetchScalarGridSpec(
            num_scalar_prefetch=0,
            grid=(n_tiles,),
            in_specs=[
                pl.BlockSpec((bb, D), lambda i: (i, 0)),            # x tile
                pl.BlockSpec((D, HIDDEN), lambda i: (0, 0)),        # W1 (resident)
                pl.BlockSpec((1, HIDDEN), lambda i: (0, 0)),        # b1
                pl.BlockSpec((HIDDEN, HIDDEN), lambda i: (0, 0)),   # W2 (resident)
                pl.BlockSpec((1, HIDDEN), lambda i: (0, 0)),        # b2
                pl.BlockSpec((1, HIDDEN), lambda i: (0, 0)),        # W3^T (resident)
                pl.BlockSpec((1, 1), lambda i: (0, 0)),             # b3
            ],
            out_specs=pl.BlockSpec((1, bb), lambda i: (i, 0)),      # lane-dense
        ),
        compiler_params=pltpu.CompilerParams(
            dimension_semantics=("parallel",),
            vmem_limit_bytes=_VMEM_LIMIT),
    )(x, w1, b1, w2, b2, w3t, b3)

    # (n_tiles, bb) row-major is batch order; drop padded rows, restore [B, 1].
    return out.reshape(n_tiles * bb, 1)[:B]


def init_params(key, data_dim):
    """Deterministic init mirroring nn.Linear default (U[-1/sqrt(fan_in), ...])."""
    def linear(k, fan_in, fan_out):
        kw, kb = jax.random.split(k)
        bound = 1.0 / jnp.sqrt(jnp.float32(fan_in))
        w = jax.random.uniform(kw, (fan_in, fan_out), jnp.float32, -bound, bound)
        b = jax.random.uniform(kb, (1, fan_out), jnp.float32, -bound, bound)
        return w, b

    k1, k2, k3 = jax.random.split(key, 3)
    w1, b1 = linear(k1, data_dim, HIDDEN)
    w2, b2 = linear(k2, HIDDEN, HIDDEN)
    w3, b3 = linear(k3, HIDDEN, 1)
    return (w1, b1, w2, b2, w3, b3)


def reference_forward(x, params):
    w1, b1, w2, b2, w3, b3 = params
    h = jnp.dot(x, w1) + b1
    h = jnp.where(h > 0, h, 0.2 * h)
    h = jnp.dot(h, w2) + b2
    h = jnp.where(h > 0, h, 0.2 * h)
    h = jnp.dot(h, w3) + b3
    return jax.nn.sigmoid(h)


if __name__ == "__main__":
    key = jax.random.PRNGKey(0)
    kx, kp = jax.random.split(key)

    batch = 8
    data_dim = 32

    x = jax.random.normal(kx, (batch, data_dim), jnp.float32)
    params = init_params(kp, data_dim)
    ref = reference_forward(x, params)

    # f32 path (exact module semantics): tight tolerance.
    prep_f32 = prepare_params(params, jnp.float32)
    out = jax.block_until_ready(discriminator_forward(x, prep_f32))
    assert out.shape == (batch, 1), out.shape
    assert jnp.allclose(out, ref, atol=1e-5, rtol=1e-5), (
        f"f32 max abs err = {jnp.max(jnp.abs(out - ref))}")

    # bf16 operands / f32 accumulation (v6e / v7x MXU path): loose tolerance.
    prep_bf16 = prepare_params(params, jnp.bfloat16)
    out_bf16 = jax.block_until_ready(discriminator_forward(x, prep_bf16))
    assert out_bf16.shape == (batch, 1), out_bf16.shape
    assert jnp.allclose(out_bf16, ref, atol=2e-2, rtol=2e-2), (
        f"bf16 max abs err = {jnp.max(jnp.abs(out_bf16 - ref))}")

    print("KERNEL_OK")
</pallas_src>

<mosaic_0001>
module attributes {stable_mosaic.version = 11 : i64} {
  func.func @discriminator_kernel(%arg0: i32, %arg1: memref<8x32xf32, #tpu.memory_space<vmem>>, %arg2: memref<32x256xf32, #tpu.memory_space<vmem>>, %arg3: memref<1x256xf32, #tpu.memory_space<vmem>>, %arg4: memref<256x256xf32, #tpu.memory_space<vmem>>, %arg5: memref<1x256xf32, #tpu.memory_space<vmem>>, %arg6: memref<1x256xf32, #tpu.memory_space<vmem>>, %arg7: memref<1x1xf32, #tpu.memory_space<vmem>>, %arg8: memref<1x8xf32, #tpu.memory_space<vmem>>) attributes {dimension_semantics = [#tpu.dimension_semantics<parallel>], iteration_bounds = array<i64: 1>, scalar_prefetch = 0 : i64, scratch_operands = 0 : i64, tpu.core_type = #tpu.core_type<tc>, window_params = [{transform_indices = @transform_0, window_bounds = array<i64: 8, 32>}, {pipeline_mode = #tpu.pipeline_mode<synchronous>, transform_indices = @transform_1, window_bounds = array<i64: 32, 256>}, {pipeline_mode = #tpu.pipeline_mode<synchronous>, transform_indices = @transform_2, window_bounds = array<i64: 1, 256>}, {pipeline_mode = #tpu.pipeline_mode<synchronous>, transform_indices = @transform_3, window_bounds = array<i64: 256, 256>}, {pipeline_mode = #tpu.pipeline_mode<synchronous>, transform_indices = @transform_4, window_bounds = array<i64: 1, 256>}, {pipeline_mode = #tpu.pipeline_mode<synchronous>, transform_indices = @transform_5, window_bounds = array<i64: 1, 256>}, {pipeline_mode = #tpu.pipeline_mode<synchronous>, transform_indices = @transform_6, window_bounds = array<i64: 1, 1>}, {transform_indices = @transform_7, window_bounds = array<i64: 1, 8>}]} {
    %c0 = arith.constant 0 : index
    %c0_0 = arith.constant 0 : index
    %0 = vector.load %arg1[%c0, %c0_0] : memref<8x32xf32, #tpu.memory_space<vmem>>, vector<8x32xf32>
    %c0_1 = arith.constant 0 : index
    %c0_2 = arith.constant 0 : index
    %1 = vector.load %arg2[%c0_1, %c0_2] : memref<32x256xf32, #tpu.memory_space<vmem>>, vector<32x256xf32>
    %cst = arith.constant dense<0.000000e+00> : vector<8x256xf32>
    %2 = tpu.matmul %0, %1, %cst {dimension_numbers = #tpu.dot_dimension_numbers<[1], [0], [0], [1], [0, 0, 1, 1], [], []>} : vector<8x32xf32>, vector<32x256xf32>, vector<8x256xf32> -> vector<8x256xf32>
    %c0_3 = arith.constant 0 : index
    %c0_4 = arith.constant 0 : index
    %3 = vector.load %arg3[%c0_3, %c0_4] : memref<1x256xf32, #tpu.memory_space<vmem>>, vector<1x256xf32>
    %4 = vector.broadcast %3 : vector<1x256xf32> to vector<8x256xf32>
    %5 = arith.addf %2, %4 : vector<8x256xf32>
    %cst_5 = arith.constant 2.000000e-01 : f32
    %6 = vector.broadcast %cst_5 : f32 to vector<8x256xf32>
    %7 = arith.mulf %6, %5 : vector<8x256xf32>
    %8 = arith.maximumf %5, %7 : vector<8x256xf32>
    %c0_6 = arith.constant 0 : index
    %c0_7 = arith.constant 0 : index
    %9 = vector.load %arg4[%c0_6, %c0_7] : memref<256x256xf32, #tpu.memory_space<vmem>>, vector<256x256xf32>
    %cst_8 = arith.constant dense<0.000000e+00> : vector<8x256xf32>
    %10 = tpu.matmul %8, %9, %cst_8 {dimension_numbers = #tpu.dot_dimension_numbers<[1], [0], [0], [1], [0, 0, 1, 1], [], []>} : vector<8x256xf32>, vector<256x256xf32>, vector<8x256xf32> -> vector<8x256xf32>
    %c0_9 = arith.constant 0 : index
    %c0_10 = arith.constant 0 : index
    %11 = vector.load %arg5[%c0_9, %c0_10] : memref<1x256xf32, #tpu.memory_space<vmem>>, vector<1x256xf32>
    %12 = vector.broadcast %11 : vector<1x256xf32> to vector<8x256xf32>
    %13 = arith.addf %10, %12 : vector<8x256xf32>
    %cst_11 = arith.constant 2.000000e-01 : f32
    %14 = vector.broadcast %cst_11 : f32 to vector<8x256xf32>
    %15 = arith.mulf %14, %13 : vector<8x256xf32>
    %16 = arith.maximumf %13, %15 : vector<8x256xf32>
    %c0_12 = arith.constant 0 : index
    %c0_13 = arith.constant 0 : index
    %17 = vector.load %arg6[%c0_12, %c0_13] : memref<1x256xf32, #tpu.memory_space<vmem>>, vector<1x256xf32>
    %cst_14 = arith.constant dense<0.000000e+00> : vector<1x8xf32>
    %18 = tpu.matmul %17, %16, %cst_14 {dimension_numbers = #tpu.dot_dimension_numbers<[1], [1], [0], [0], [0, 0, 1, 0], [], []>} : vector<1x256xf32>, vector<8x256xf32>, vector<1x8xf32> -> vector<1x8xf32>
    %c0_15 = arith.constant 0 : index
    %c0_16 = arith.constant 0 : index
    %19 = vector.load %arg7[%c0_15, %c0_16] : memref<1x1xf32, #tpu.memory_space<vmem>>, vector<1x1xf32>
    %20 = vector.broadcast %19 : vector<1x1xf32> to vector<1x8xf32>
    %21 = arith.addf %18, %20 : vector<1x8xf32>
    %22 = arith.negf %21 : vector<1x8xf32>
    %23 = math.exp %22 : vector<1x8xf32>
    %cst_17 = arith.constant 1.000000e+00 : f32
    %24 = vector.broadcast %cst_17 : f32 to vector<1x8xf32>
    %25 = arith.addf %24, %23 : vector<1x8xf32>
    %26 = arith.divf %24, %25 : vector<1x8xf32>
    %c0_18 = arith.constant 0 : index
    %c0_19 = arith.constant 0 : index
    %27 = vector.load %arg8[%c0_18, %c0_19] : memref<1x8xf32, #tpu.memory_space<vmem>>, vector<1x8xf32>
    tpu.vector_store %arg8[%c0_18, %c0_19], %26 {strides = array<i32>} : memref<1x8xf32, #tpu.memory_space<vmem>>, vector<1x8xf32>,
    return
  }
  func.func @transform_0(%arg0: i32) -> (i32, i32) {
    %c0_i32 = arith.constant 0 : i32
    %c0_i32_0 = arith.constant 0 : i32
    return %arg0, %c0_i32 : i32, i32
  }
  func.func @transform_1(%arg0: i32) -> (i32, i32) {
    %c0_i32 = arith.constant 0 : i32
    %c0_i32_0 = arith.constant 0 : i32
    %c0_i32_1 = arith.constant 0 : i32
    return %c0_i32, %c0_i32_0 : i32, i32
  }
  func.func @transform_2(%arg0: i32) -> (i32, i32) {
    %c0_i32 = arith.constant 0 : i32
    %c0_i32_0 = arith.constant 0 : i32
    %c0_i32_1 = arith.constant 0 : i32
    return %c0_i32, %c0_i32_0 : i32, i32
  }
  func.func @transform_3(%arg0: i32) -> (i32, i32) {
    %c0_i32 = arith.constant 0 : i32
    %c0_i32_0 = arith.constant 0 : i32
    %c0_i32_1 = arith.constant 0 : i32
    return %c0_i32, %c0_i32_0 : i32, i32
  }
  func.func @transform_4(%arg0: i32) -> (i32, i32) {
    %c0_i32 = arith.constant 0 : i32
    %c0_i32_0 = arith.constant 0 : i32
    %c0_i32_1 = arith.constant 0 : i32
    return %c0_i32, %c0_i32_0 : i32, i32
  }
  func.func @transform_5(%arg0: i32) -> (i32, i32) {
    %c0_i32 = arith.constant 0 : i32
    %c0_i32_0 = arith.constant 0 : i32
    %c0_i32_1 = arith.constant 0 : i32
    return %c0_i32, %c0_i32_0 : i32, i32
  }
  func.func @transform_6(%arg0: i32) -> (i32, i32) {
    %c0_i32 = arith.constant 0 : i32
    %c0_i32_0 = arith.constant 0 : i32
    %c0_i32_1 = arith.constant 0 : i32
    return %c0_i32, %c0_i32_0 : i32, i32
  }
  func.func @transform_7(%arg0: i32) -> (i32, i32) {
    %c0_i32 = arith.constant 0 : i32
    %c0_i32_0 = arith.constant 0 : i32
    return %arg0, %c0_i32 : i32, i32
  }
}

</mosaic_0001>

<bundles_post_ra>
// kernel: discriminator_forward.1
= control target key start
LH: loop header
LB: loop body
LE: loop exit
PB: predicated region body
PF: predicated region fallthrough
CT: control target
= control target key end

     0   :  { %s608_s0 = inlined_call_operand.hbm [shape: f32[8,32], index: 0, kind: input, shape index: {}]   ;;  %s609_s1 = inlined_call_operand.hbm [shape: f32[32,256], index: 1, kind: input, shape index: {}]   ;;  %s610_s2 = inlined_call_operand.vmem [shape: f32[1,256], index: 2, kind: input, shape index: {}]   ;;  %s611_s3 = inlined_call_operand.hbm [shape: f32[256,256], index: 3, kind: input, shape index: {}]   ;;  %s612_s4 = inlined_call_operand.vmem [shape: f32[1,256], index: 4, kind: input, shape index: {}]   ;;  %s613_s5 = inlined_call_operand.vmem [shape: f32[1,256], index: 5, kind: input, shape index: {}]   ;;  %s614_s6 = inlined_call_operand.<no memory space> [shape: f32[1,1], index: 6, kind: input, shape index: {}]   ;;  %s615_s7 = inlined_call_operand.hbm [shape: f32[1,8], index: 7, kind: output, shape index: {}]  }
   0x1   :  { %v12_v0 = vstv %s614_s6 }
   0x2   :  { %13 = vst [vmem:[#allocation2] sm:$0x1] %v12_v0 }
   0x3   :  { %14 = vsyncpa [#allocation4], 0 }
   0x4   :  { %15 = vsyncpa [#allocation7], 0 }
   0x5   :  { %16 = vsyncpa [#allocation5], 0  ;;  %s536_s26 = smov [#allocation6]  }
   0x6   :  { %s32_s27 = sshll.u32 %s536_s26, 4  ;;  %s33_s27 = int_to_ptr.vmem [resolvable:$true] %s32_s27 }
   0x7   :  { %s458_s28 = scalar_lea.vmem %s33_s27, 1024  ;;  %p463_p1 = scmp.lt.s32.totalorder %s33_s27, %s33_s27 }
   0x8   :  { %p459_p0 = scmp.ne.s32.totalorder %s33_s27, %s458_s28  ;;  %p464_p2 = scmp.lt.s32.totalorder %s458_s28, %s458_s28 }
   0xa   :  { %p465_p3 = por %p464_p2, %p463_p1 }
   0xc   :  { %p466_p4 = pnand %p465_p3, %p459_p0 }
   0xe   :  { %469 = shalt.err (!%p466_p4)
}
   0xf   :  { %s537_s29 = smov 256   ;;  %s538_s30 = smov 16  }
  0x10   :  { %38 = dma.hbm_to_vmem [thread:$0]  %s609_s1, 1024, %s33_s27, [#allocation7], %s537_s29, %s537_s29, %s538_s30  }
  0x11   :  { %s539_s6 = smov [#allocation3]   ;;  %s540_s11 = smov [#allocation8]  }
  0x12   :  { %s23_s10 = sshll.u32 %s539_s6, 4  ;;  %s46_s12 = sshll.u32 %s540_s11, 4  ;;  %s24_s10 = int_to_ptr.vmem [resolvable:$true] %s23_s10  ;;  %s47_s12 = int_to_ptr.vmem [resolvable:$true] %s46_s12 }
  0x13   :  { %s478_s13 = scalar_lea.vmem %s24_s10, 128  ;;  %p483_p6 = scmp.lt.s32.totalorder %s24_s10, %s24_s10 }
  0x14   :  { %p479_p5 = scmp.ne.s32.totalorder %s24_s10, %s478_s13  ;;  %p484_p7 = scmp.lt.s32.totalorder %s478_s13, %s478_s13 }
  0x16   :  { %p485_p8 = por %p484_p7, %p483_p6 }
  0x18   :  { %p486_p9 = pnand %p485_p8, %p479_p5 }
  0x1a   :  { %489 = shalt.err (!%p486_p9)
}
  0x1b   :  { %26 = dma.hbm_to_vmem [thread:$0]  %s608_s0, 128, %s24_s10, [#allocation4]  }
  0x1c   :  { %s498_s16 = scalar_lea.vmem %s47_s12, 8192  ;;  %p503_p11 = scmp.lt.s32.totalorder %s47_s12, %s47_s12 }
  0x1d   :  { %p499_p10 = scmp.ne.s32.totalorder %s47_s12, %s498_s16  ;;  %p504_p12 = scmp.lt.s32.totalorder %s498_s16, %s498_s16 }
  0x1f   :  { %p505_p13 = por %p504_p12, %p503_p11 }
  0x21   :  { %p506_p0 = pnand %p505_p13, %p499_p10 }
  0x23   :  { %509 = shalt.err (!%p506_p0)
}
  0x24   :  { %52 = dma.hbm_to_vmem [thread:$0]  %s611_s3, 8192, %s47_s12, [#allocation7], %s537_s29, %s537_s29, %s538_s30  }
  0x25   :  { %530 = dma.done.wait [#allocation4], 128  }
  0x26   :  { %531 = vsyncadd [#allocation4], 4294967168 }
  0x27   :  { %532 = dma.done.wait [#allocation7], 9216  }
  0x28   :  { %533 = vsyncadd [#allocation7], 4294958080  ;;  %v541_v1 = vmov 0.0   ;;  %v76_v2 = vld [vmem:[#allocation6 + $0x38] sm:$0xff]  ;;  %v75_v3 = vld [vmem:[#allocation6 + $0x30] sm:$0xff]  ;;  %vm89_vm0 = vcmask 261120  }
  0x29   :  { %157 = vmatprep.mubr.f32.mxu0 %v541_v1  ;;  %v74_v4 = vld [vmem:[#allocation6 + $0x28] sm:$0xff]  ;;  %117 = vmatprep.subr.mxu0 %v76_v2  ;;  %v73_v5 = vld [vmem:[#allocation6 + $0x20] sm:$0xff]  ;;  %v72_v6 = vld [vmem:[#allocation6 + $0x18] sm:$0xff]  ;;  %vm417_vm1 = vcmask 57344  }
  0x2a   :  { %118 = vmatpush1.msra.mxu0 %v75_v3  ;;  %v71_v7 = vld [vmem:[#allocation6 + $0x10] sm:$0xff]  ;;  %v199_v8 = vld [vmem:[#allocation8 + $0xf8] sm:$0xff]  ;;  %v197_v10 = vld [vmem:[#allocation8 + $0xe8] sm:$0xff] }
  0x2b   :  { %119 = vmatprep.subr.mxu0 %v74_v4  ;;  %v198_v9 = vld [vmem:[#allocation8 + $0xf0] sm:$0xff]  ;;  %v70_v11 = vld [vmem:[#allocation6 + $0x8] sm:$0xff]  ;;  %244 = vmatprep.subr.mxu1 %v199_v8  ;;  %v196_v12 = vld [vmem:[#allocation8 + $0xe0] sm:$0xff] }
  0x2c   :  { %120 = vmatpush1.msra.mxu0 %v73_v5  ;;  %v69_v13 = vld [vmem:[#allocation6] sm:$0xff]  ;;  %245 = vmatpush1.msra.mxu1 %v198_v9  ;;  %v195_v14 = vld [vmem:[#allocation8 + $0xd8] sm:$0xff]  ;;  %v194_v16 = vld [vmem:[#allocation8 + $0xd0] sm:$0xff] }
  0x2d   :  { %121 = vmatprep.subr.mxu0 %v72_v6  ;;  %v68_v15 = vld [vmem:[#allocation3] sm:$0xff]  ;;  %246 = vmatprep.subr.mxu1 %v197_v10  ;;  %v193_v17 = vld [vmem:[#allocation8 + $0xc8] sm:$0xff]  ;;  %v192_v18 = vld [vmem:[#allocation8 + $0xc0] sm:$0xff] }
  0x2e   :  { %122 = vmatpush1.msra.mxu0 %v71_v7  ;;  %247 = vmatpush1.msra.mxu1 %v196_v12  ;;  %v191_v19 = vld [vmem:[#allocation8 + $0xb8] sm:$0xff]  ;;  %v190_v20 = vld [vmem:[#allocation8 + $0xb0] sm:$0xff]  ;;  %v189_v21 = vld [vmem:[#allocation8 + $0xa8] sm:$0xff] }
  0x2f   :  { %123 = vmatprep.subr.mxu0 %v70_v11  ;;  %248 = vmatprep.subr.mxu1 %v195_v14  ;;  %v188_v22 = vld [vmem:[#allocation8 + $0xa0] sm:$0xff]  ;;  %v187_v23 = vld [vmem:[#allocation8 + $0x98] sm:$0xff]  ;;  %v186_v24 = vld [vmem:[#allocation8 + $0x90] sm:$0xff]  ;;  %v79_v11 = vlaneseq }
  0x30   :  { %124 = vmatpush1.msra.mxu0 %v69_v13  ;;  %249 = vmatpush1.msra.mxu1 %v194_v16  ;;  %v185_v25 = vld [vmem:[#allocation8 + $0x88] sm:$0xff]  ;;  %v184_v26 = vld [vmem:[#allocation8 + $0x80] sm:$0xff]  ;;  %v183_v27 = vld [vmem:[#allocation8 + $0x78] sm:$0xff] }
  0x31   :  { %435 = vmatmul.mubr.msk.f32.vlgmr.msra.gmra.mxu0 %vm89_vm0, %v68_v15  ;;  %250 = vmatprep.subr.mxu1 %v193_v17  ;;  %v182_v28 = vld [vmem:[#allocation8 + $0x70] sm:$0xff]  ;;  %v181_v29 = vld [vmem:[#allocation8 + $0x68] sm:$0xff]  ;;  %v180_v30 = vld [vmem:[#allocation8 + $0x60] sm:$0xff]  ;;  %v80_v12 = vshrl.u32 %v79_v11, 7 }
  0x32   :  { %251 = vmatpush1.msra.mxu1 %v192_v18  ;;  %v179_v31 = vld [vmem:[#allocation8 + $0x58] sm:$0xff]  ;;  %v178_v32 = vld [vmem:[#allocation8 + $0x50] sm:$0xff]  ;;  %v177_v33 = vld [vmem:[#allocation8 + $0x48] sm:$0xff] }
  0x33   :  { %252 = vmatprep.subr.mxu1 %v191_v19  ;;  %v176_v34 = vld [vmem:[#allocation8 + $0x40] sm:$0xff]  ;;  %v175_v35 = vld [vmem:[#allocation8 + $0x38] sm:$0xff]  ;;  %v174_v36 = vld [vmem:[#allocation8 + $0x30] sm:$0xff]  ;;  %v81_v13 = vsub.s32 0, %v80_v12  ;;  %v85_v15 = vsub.s32 1, %v80_v12 }
  0x34   :  { %253 = vmatpush1.msra.mxu1 %v190_v20  ;;  %v173_v37 = vld [vmem:[#allocation8 + $0x28] sm:$0xff]  ;;  %v172_v38 = vld [vmem:[#allocation8 + $0x20] sm:$0xff]  ;;  %v171_v39 = vld [vmem:[#allocation8 + $0x18] sm:$0xff] }
  0x35   :  { %254 = vmatprep.subr.mxu1 %v189_v21  ;;  %v170_v40 = vld [vmem:[#allocation8 + $0x10] sm:$0xff]  ;;  %v169_v41 = vld [vmem:[#allocation8 + $0x8] sm:$0xff]  ;;  %v168_v42 = vld [vmem:[#allocation8] sm:$0xff] }
  0x36   :  { %255 = vmatpush1.msra.mxu1 %v188_v22  ;;  %v231_v43 = vld [vmem:[#allocation8 + $0x1f8] sm:$0xff]  ;;  %v230_v44 = vld [vmem:[#allocation8 + $0x1f0] sm:$0xff]  ;;  %v229_v45 = vld [vmem:[#allocation8 + $0x1e8] sm:$0xff] }
  0x37   :  { %256 = vmatprep.subr.mxu1 %v187_v23  ;;  %v228_v46 = vld [vmem:[#allocation8 + $0x1e0] sm:$0xff]  ;;  %v227_v47 = vld [vmem:[#allocation8 + $0x1d8] sm:$0xff]  ;;  %v226_v48 = vld [vmem:[#allocation8 + $0x1d0] sm:$0xff] }
  0x38   :  { %257 = vmatpush1.msra.mxu1 %v186_v24  ;;  %v225_v49 = vld [vmem:[#allocation8 + $0x1c8] sm:$0xff]  ;;  %v224_v50 = vld [vmem:[#allocation8 + $0x1c0] sm:$0xff]  ;;  %v223_v51 = vld [vmem:[#allocation8 + $0x1b8] sm:$0xff] }
  0x39   :  { %258 = vmatprep.subr.mxu1 %v185_v25  ;;  %v222_v52 = vld [vmem:[#allocation8 + $0x1b0] sm:$0xff]  ;;  %v221_v53 = vld [vmem:[#allocation8 + $0x1a8] sm:$0xff]  ;;  %v220_v54 = vld [vmem:[#allocation8 + $0x1a0] sm:$0xff] }
  0x3a   :  { %259 = vmatpush1.msra.mxu1 %v184_v26  ;;  %v219_v55 = vld [vmem:[#allocation8 + $0x198] sm:$0xff]  ;;  %v218_v56 = vld [vmem:[#allocation8 + $0x190] sm:$0xff]  ;;  %v217_v57 = vld [vmem:[#allocation8 + $0x188] sm:$0xff] }
  0x3b   :  { %260 = vmatprep.subr.mxu1 %v183_v27  ;;  %v216_v58 = vld [vmem:[#allocation8 + $0x180] sm:$0xff]  ;;  %v215_v59 = vld [vmem:[#allocation8 + $0x178] sm:$0xff]  ;;  %v214_v60 = vld [vmem:[#allocation8 + $0x170] sm:$0xff] }
  0x3c   :  { %261 = vmatpush1.msra.mxu1 %v182_v28  ;;  %v213_v61 = vld [vmem:[#allocation8 + $0x168] sm:$0xff]  ;;  %v212_v62 = vld [vmem:[#allocation8 + $0x160] sm:$0xff]  ;;  %v211_v63 = vld [vmem:[#allocation8 + $0x158] sm:$0xff] }
  0x3d   :  { %262 = vmatprep.subr.mxu1 %v181_v29  ;;  %v210_v0 = vld [vmem:[#allocation8 + $0x150] sm:$0xff]  ;;  %v209_v1 = vld [vmem:[#allocation8 + $0x148] sm:$0xff]  ;;  %v208_v2 = vld [vmem:[#allocation8 + $0x140] sm:$0xff]  ;;  %v542_v29 = vmov 0  }
  0x3e   :  { %263 = vmatpush1.msra.mxu1 %v180_v30  ;;  %v207_v3 = vld [vmem:[#allocation8 + $0x138] sm:$0xff]  ;;  %v206_v4 = vld [vmem:[#allocation8 + $0x130] sm:$0xff]  ;;  %v205_v5 = vld [vmem:[#allocation8 + $0x128] sm:$0xff]  ;;  %445 = vset.pattern.permute.xlu0 %v542_v29 }
  0x3f   :  { %264 = vmatprep.subr.mxu1 %v179_v31  ;;  %v204_v6 = vld [vmem:[#allocation8 + $0x120] sm:$0xff]  ;;  %v203_v7 = vld [vmem:[#allocation8 + $0x118] sm:$0xff]  ;;  %v202_v8 = vld [vmem:[#allocation8 + $0x110] sm:$0xff] }
  0x40   :  { %265 = vmatpush1.msra.mxu1 %v178_v32  ;;  %v201_v9 = vld [vmem:[#allocation8 + $0x108] sm:$0xff]  ;;  %v200_v10 = vld [vmem:[#allocation8 + $0x100] sm:$0xff]  ;;  %v77_v14 = vld [vmem:[%s610_s2] sm:$0x3] }
  0x41   :  { %266 = vmatprep.subr.mxu1 %v177_v33  ;;  %v82_v16 = vrot.slane %v77_v14, %v81_v13  ;;  %v86_v17 = vrot.slane %v77_v14, %v85_v15  ;;  %v319_v26 = vld [vmem:[%s613_s5] sm:$0x3] }
  0x42   :  { %267 = vmatpush1.msra.mxu1 %v176_v34  ;;  %v338_v27 = vrot.slane %v319_v26, %v85_v15  ;;  %v320_v28 = vld [vmem:[#allocation2] sm:$0x1] }
  0x43   :  { %268 = vmatprep.subr.mxu1 %v175_v35  ;;  %323 = vperm.xlu0 %445, %v320_v28   ;;  %v232_v30 = vld [vmem:[%s612_s4] sm:$0x3]  ;;  %s543_s4 = smov [#allocation9]  }
  0x44   :  { %269 = vmatpush1.msra.mxu1 %v174_v36  ;;  %405 = vmatprep.mubr.f32.mxu0 %v338_v27  ;;  %v237_v31 = vrot.slane %v232_v30, %v81_v13  ;;  %v241_v32 = vrot.slane %v232_v30, %v85_v15  ;;  %s425_s5 = sshll.u32 %s543_s4, 4  ;;  %s426_s5 = int_to_ptr.vmem [resolvable:$true] %s425_s5 }
  0x45   :  { %270 = vmatprep.subr.mxu1 %v173_v37  ;;  %s510_s21 = scalar_lea.vmem %s426_s5, 16  ;;  %s514_s22 = scalar_lea.vmem %s426_s5, 32 }
  0x46   :  { %271 = vmatpush1.msra.mxu1 %v172_v38  ;;  %p511_p1 = scmp.ne.s32.totalorder %s426_s5, %s510_s21  ;;  %p515_p2 = scmp.lt.s32.totalorder %s426_s5, %s426_s5 }
  0x47   :  { %272 = vmatprep.subr.mxu1 %v171_v39  ;;  %p516_p3 = scmp.lt.s32.totalorder %s514_s22, %s510_s21 }
  0x48   :  { %273 = vmatpush1.msra.mxu1 %v170_v40 }
  0x49   :  { %274 = vmatprep.subr.mxu1 %v169_v41  ;;  %v334_v41 = vrot.slane %v319_v26, %v81_v13  ;;  %p517_p4 = por %p516_p3, %p515_p2 }
  0x4a   :  { %275 = vmatpush1.msra.mxu1 %v168_v42 }
  0x4b   :  { %276 = vmatprep.subr.mxu1 %v231_v43  ;;  %p518_p5 = pnand %p517_p4, %p511_p1 }
  0x4c   :  { %277 = vmatpush2.msra.mxu1 %v230_v44 }
  0x4d   :  { %278 = vmatprep.subr.mxu1 %v229_v45 }
  0x4e   :  { %279 = vmatpush2.msra.mxu1 %v228_v46 }
  0x4f   :  { %280 = vmatprep.subr.mxu1 %v227_v47 }
  0x50   :  { %281 = vmatpush2.msra.mxu1 %v226_v48 }
  0x51   :  { %282 = vmatprep.subr.mxu1 %v225_v49 }
  0x52   :  { %283 = vmatpush2.msra.mxu1 %v224_v50 }
  0x53   :  { %284 = vmatprep.subr.mxu1 %v223_v51 }
  0x54   :  { %285 = vmatpush2.msra.mxu1 %v222_v52 }
  0x55   :  { %286 = vmatprep.subr.mxu1 %v221_v53 }
  0x56   :  { %287 = vmatpush2.msra.mxu1 %v220_v54 }
  0x57   :  { %288 = vmatprep.subr.mxu1 %v219_v55 }
  0x58   :  { %289 = vmatpush2.msra.mxu1 %v218_v56 }
  0x59   :  { %290 = vmatprep.subr.mxu1 %v217_v57 }
  0x5a   :  { %291 = vmatpush2.msra.mxu1 %v216_v58 }
  0x5b   :  { %292 = vmatprep.subr.mxu1 %v215_v59 }
  0x5c   :  { %293 = vmatpush2.msra.mxu1 %v214_v60 }
  0x5d   :  { %294 = vmatprep.subr.mxu1 %v213_v61 }
  0x5e   :  { %295 = vmatpush2.msra.mxu1 %v212_v62 }
  0x5f   :  { %296 = vmatprep.subr.mxu1 %v211_v63 }
  0x60   :  { %297 = vmatpush2.msra.mxu1 %v210_v0 }
  0x61   :  { %298 = vmatprep.subr.mxu1 %v209_v1 }
  0x62   :  { %299 = vmatpush2.msra.mxu1 %v208_v2 }
  0x63   :  { %300 = vmatprep.subr.mxu1 %v207_v3 }
  0x64   :  { %301 = vmatpush2.msra.mxu1 %v206_v4 }
  0x65   :  { %302 = vmatprep.subr.mxu1 %v205_v5 }
  0x66   :  { %303 = vmatpush2.msra.mxu1 %v204_v6 }
  0x67   :  { %304 = vmatprep.subr.mxu1 %v203_v7 }
  0x68   :  { %305 = vmatpush2.msra.mxu1 %v202_v8 }
  0x69   :  { %306 = vmatprep.subr.mxu1 %v201_v9 }
  0x6a   :  { %307 = vmatpush2.msra.mxu1 %v200_v10 }
  0xbe   :  { %v324_v42 = vpop.permute.xlu0 %323 }
  0xbf   :  { %v329_v43 = vrot.slane %v324_v42, %v81_v13 }
  0xf1   :  { %v159_v18 = vpop.f32.mrf.mxu0 }
  0xf2   :  { %v160_v19 = vadd.f32 %v159_v18, %v82_v16 }
  0xf3   :  { %v161_v20 = vpop.f32.mrf.mxu0 }
  0xf4   :  { %v162_v21 = vadd.f32 %v161_v20, %v86_v17  ;;  %v164_v22 = vmul.f32 0.2, %v160_v19 }
  0xf6   :  { %v165_v23 = vmul.f32 0.2, %v162_v21  ;;  %v166_v25 = vmax.f32 %v160_v19, %v164_v22 }
  0xf8   :  { %v167_v24 = vmax.f32 %v162_v21, %v165_v23 }
  0xfa   :  { %308 = vmatprep.mubr.f32.mxu1 %v167_v24 }
  0xfb   :  { %309 = vmatmul.mubr.f32.vlgmr.msra.gmra.mxu1 %v166_v25 }
 0x1bb   :  { %v310_v33 = vpop.f32.mrf.mxu1 }
 0x1bc   :  { %v311_v34 = vadd.f32 %v310_v33, %v237_v31 }
 0x1bd   :  { %v312_v35 = vpop.f32.mrf.mxu1 }
 0x1be   :  { %v313_v36 = vadd.f32 %v312_v35, %v241_v32  ;;  %v315_v37 = vmul.f32 0.2, %v311_v34 }
 0x1c0   :  { %v316_v38 = vmul.f32 0.2, %v313_v36  ;;  %v317_v40 = vmax.f32 %v311_v34, %v315_v37 }
 0x1c2   :  { %v318_v39 = vmax.f32 %v313_v36, %v316_v38 }
 0x1c4   :  { %371 = vmatprep.subr.mxu0 %v318_v39 }
 0x1c5   :  { %372 = vmatpush1.xpose.msra.mxu0 %v317_v40 }
 0x1c8   :  { %406 = vmatmul.mubr.f32.vlgmr.msra.gmra.mxu0 %v334_v41 }
 0x288   :  { %v407_v44 = vpop.f32.mrf.mxu0 }
 0x289   :  { %v408_v45 = vadd.f32 %v407_v44, %v329_v43 }
 0x28a   :  { %v409_v46 = vpop.f32.mrf.mxu0 }
 0x28b   :  { %v436_v47 = vmul.f32 -1.442695, %v408_v45 }
 0x28d   :  { %446 = vpow2.f32 %v436_v47 }
 0x29a   :  { %v447_v48 = vpop.eup %446 }
 0x29b   :  { %v414_v49 = vadd.f32 1.0, %v447_v48 }
 0x29d   :  { %448 = vrcp.f32 %v414_v49 }
 0x2aa   :  { %v449_v50 = vpop.eup %448 }
 0x2ab   :  { %418 = vst.msk [vmem:[#allocation9] sm:$0x1] %vm417_vm1, %v449_v50 }
 0x2ac   :  { %521 = shalt.err (!%p518_p5)
}
 0x2ad   :  { %428 = dma.vmem_to_hbm [thread:$0]  %s426_s5, 16, %s615_s7, [#allocation5]  }
 0x2ae   :  { %534 = dma.done.wait [#allocation5], 16  }
 0x2af   :  { %535 = vsyncadd [#allocation5], 4294967280 }
 0x2b0   :  { %432 = vsyncpa [#allocation4], 1 }
 0x2b1   :  { %433 = vsyncpa [#allocation7], 1 }
 0x2b2   :  { %434 = vsyncpa [#allocation5], 1 }

</bundles_post_ra>
